<compile_context>
chip_gen: v7x
topology: tpu7x:2x2x1
jax: 0.10.0
libtpu: 0.0.40
codegen_flags: <defaults>
</compile_context>

<pallas_src>
import jax
import jax.numpy as jnp
from jax.experimental import pallas as pl
from jax.experimental.pallas import tpu as pltpu

LANE_MIN = 128                          # minimum (and fallback) lane width
SUBLANE = 8                             # sublane granularity (f32)
TARGET_BLOCK_BYTES = 4 * 1024 * 1024    # ~4 MiB per VMEM buffer
VMEM_LIMIT_BYTES = 32 * 1024 * 1024     # safe on v5e/v6e (128 MiB) and v7x (64 MiB)


def _round_up(n, m):
    return (n + m - 1) // m * m


def _lif_kernel(thresh_ref, x_ref, o_ref):
    # thresh_ref: (1,) f32 scalar in SMEM (no recompile when thresh changes).
    # x_ref / o_ref: (tile_rows, lane) VMEM tiles in the caller's native dtype.
    x = x_ref[...]
    t = thresh_ref[0].astype(x.dtype)   # compute in native dtype (bf16 native on v6e/v7x)
    o_ref[...] = jnp.where(x >= t, t, jnp.zeros((), x.dtype))


def _lif_pallas_1d(flat_main, thresh_arr, dtype):
    """Run the elementwise LIF kernel on a 128-aligned flat array."""
    main = flat_main.shape[0]
    dtype_bytes = jnp.dtype(dtype).itemsize

    # Prefer a wider lane-dense last dim (longer unmasked vst / fewer DMA
    # descriptors), as long as it still leaves >= 16 rows to tile over.
    lane = LANE_MIN
    for cand in (1024, 512, 256):
        if main % cand == 0 and (main // cand) >= 2 * SUBLANE:
            lane = cand
            break
    rows = main // lane
    slab = flat_main.reshape(rows, lane)

    # ~4 MiB blocks amortize per-grid-step overhead; also clamp so the grid has
    # >= 2 steps whenever possible (lets v7x shard across both TensorCores).
    target_rows = max(
        SUBLANE,
        (TARGET_BLOCK_BYTES // (lane * dtype_bytes)) // SUBLANE * SUBLANE,
    )
    if rows <= SUBLANE:
        tile_rows = rows                      # full-extent block for tiny inputs
    else:
        half = _round_up(pl.cdiv(rows, 2), SUBLANE)
        tile_rows = min(target_rows, half)
    grid = (pl.cdiv(rows, tile_rows),)        # ragged last block is masked by Pallas

    out_slab = pl.pallas_call(
        _lif_kernel,
        out_shape=jax.ShapeDtypeStruct((rows, lane), dtype),
        grid=grid,
        in_specs=[
            pl.BlockSpec(memory_space=pltpu.MemorySpace.SMEM),   # thresh scalar
            pl.BlockSpec((tile_rows, lane), lambda i: (i, 0)),
        ],
        out_specs=pl.BlockSpec((tile_rows, lane), lambda i: (i, 0)),
        compiler_params=pltpu.CompilerParams(
            dimension_semantics=("parallel",),   # megacore sharding on v7x
            vmem_limit_bytes=VMEM_LIMIT_BYTES,   # 4 bufs x 4 MiB fits on all gens
        ),
        cost_estimate=pl.CostEstimate(
            flops=main,
            transcendentals=0,
            bytes_accessed=2 * main * dtype_bytes,
        ),
    )(thresh_arr, slab)

    return out_slab.reshape(-1)


def lif_custom_forward(x: jax.Array, thresh: float = 1.0, gama: float = 1.0) -> jax.Array:
    """Forward pass of LIF_custom: spike = (x >= thresh) * thresh.

    `gama` only parameterizes the ZIF surrogate gradient (backward).
    """
    # TODO(synk): ZIF surrogate gradient (backward / custom_vjp) not implemented.
    orig_shape = x.shape
    dtype = x.dtype
    total = x.size
    if total == 0:
        return x

    flat = jnp.ravel(x)
    thresh_arr = jnp.asarray([thresh], dtype=jnp.float32)

    # 128-aligned prefix goes through the Pallas kernel; a <128-element tail is
    # handled with plain jnp (avoids the full-copy jnp.pad / slice round trip).
    main = (total // LANE_MIN) * LANE_MIN
    tail = total - main

    parts = []
    if main > 0:
        parts.append(_lif_pallas_1d(flat[:main], thresh_arr, dtype))
    if tail > 0:
        t = jnp.asarray(thresh, dtype=dtype)
        tail_x = flat[main:]
        parts.append(jnp.where(tail_x >= t, t, jnp.zeros((), dtype)))

    out_flat = parts[0] if len(parts) == 1 else jnp.concatenate(parts)
    return out_flat.reshape(orig_shape)


def _lif_reference(x, thresh=1.0):
    return (x - thresh >= 0).astype(x.dtype) * thresh


if __name__ == "__main__":
    key = jax.random.PRNGKey(0)
    # SNN activation-shaped input: (seq, batch, channels, H, W)
    x = jax.random.normal(key, (8, 2, 4, 16, 16), dtype=jnp.float32) * 2.0

    out = lif_custom_forward(x, thresh=1.0, gama=1.0)
    out = jax.block_until_ready(out)

    ref = _lif_reference(x, thresh=1.0)
    assert out.shape == x.shape
    assert out.dtype == x.dtype
    assert jnp.allclose(out, ref), "mismatch vs reference"

    print("KERNEL_OK")
</pallas_src>

<mosaic_0001>
module attributes {stable_mosaic.version = 11 : i64} {
  func.func @_lif_kernel(%arg0: i32, %arg1: memref<1xf32, #tpu.memory_space<smem>>, %arg2: memref<8x1024xf32, #tpu.memory_space<vmem>>, %arg3: memref<8x1024xf32, #tpu.memory_space<vmem>>) attributes {dimension_semantics = [#tpu.dimension_semantics<parallel>], iteration_bounds = array<i64: 2>, scalar_prefetch = 0 : i64, scratch_operands = 0 : i64, tpu.core_type = #tpu.core_type<tc>, window_params = [{transform_indices = @transform_0, window_bounds = array<i64: 1>}, {transform_indices = @transform_1, window_bounds = array<i64: 8, 1024>}, {transform_indices = @transform_2, window_bounds = array<i64: 8, 1024>}]} {
    %c0 = arith.constant 0 : index
    %c0_0 = arith.constant 0 : index
    %0 = vector.load %arg2[%c0, %c0_0] : memref<8x1024xf32, #tpu.memory_space<vmem>>, vector<8x1024xf32>
    %c0_1 = arith.constant 0 : index
    %1 = memref.load %arg1[%c0_1] : memref<1xf32, #tpu.memory_space<smem>>
    %2 = vector.broadcast %1 : f32 to vector<8x1024xf32>
    %3 = arith.cmpf oge, %0, %2 : vector<8x1024xf32>
    %cst = arith.constant 0.000000e+00 : f32
    %4 = vector.broadcast %1 : f32 to vector<8x1024xf32>
    %5 = vector.broadcast %cst : f32 to vector<8x1024xf32>
    %6 = arith.select %3, %4, %5 : vector<8x1024xi1>, vector<8x1024xf32>
    %c0_2 = arith.constant 0 : index
    %c0_3 = arith.constant 0 : index
    %7 = vector.load %arg3[%c0_2, %c0_3] : memref<8x1024xf32, #tpu.memory_space<vmem>>, vector<8x1024xf32>
    tpu.vector_store %arg3[%c0_2, %c0_3], %6 {strides = array<i32>} : memref<8x1024xf32, #tpu.memory_space<vmem>>, vector<8x1024xf32>,
    return
  }
  func.func @transform_0(%arg0: i32) -> i32 {
    %c0_i32 = arith.constant 0 : i32
    %c0_i32_0 = arith.constant 0 : i32
    return %c0_i32 : i32
  }
  func.func @transform_1(%arg0: i32) -> (i32, i32) {
    %c0_i32 = arith.constant 0 : i32
    %c0_i32_0 = arith.constant 0 : i32
    return %arg0, %c0_i32 : i32, i32
  }
  func.func @transform_2(%arg0: i32) -> (i32, i32) {
    %c0_i32 = arith.constant 0 : i32
    %c0_i32_0 = arith.constant 0 : i32
    return %arg0, %c0_i32 : i32, i32
  }
}

</mosaic_0001>

<bundles_post_ra>
// kernel: tpu_custom_call.1
= control target key start
LH: loop header
LB: loop body
LE: loop exit
PB: predicated region body
PF: predicated region fallthrough
CT: control target
= control target key end

     0   :  { %s621_s0 = inlined_call_operand.<no memory space> [shape: f32[1], index: 0, kind: input, shape index: {}]   ;;  %s622_s1 = inlined_call_operand.hbm [shape: f32[16,1024], index: 1, kind: input, shape index: {}]   ;;  %s623_s2 = inlined_call_operand.hbm [shape: f32[16,1024], index: 2, kind: output, shape index: {}]  }
   0x1   :  { %7 = sst [smem:[#allocation2]] %s621_s0 }
   0x2   :  { %8 = vsyncpa [#allocation4], 0 }
   0x3   :  { %10 = vsyncpa [#allocation4 + $0x1], 0 }
   0x4   :  { %11 = vsyncpa [#allocation5], 0 }
   0x5   :  { %13 = vsyncpa [#allocation5 + $0x1], 0  ;;  %s460_s11 = smov 0   ;;  %s462_s12 = smov 0  }
   0x6   :  { %s464_s13 = smov 0   ;;  %s466_s14 = smov 0  }
   0x7 LB: > { %s481_s0 = sadd.s32 4294967295, %s438_s14   ;;  %s280_s15 = sadd.s32 4294967294, %s438_s14   ;;  %s438_s14 = sphi %s466_s14, %s638_s14   ;;  %s434_s13 = sphi %s464_s13, %s637_s13   ;;  %s430_s12 = sphi %s462_s12, %s636_s12   ;;  %s426_s11 = sphi %s460_s11, %s635_s11  }
   0x8   : > { %s485_s16 = sadd.s32 1, %s438_s14   ;;  %s47_s17 = sadd.s32 1, %s434_s13 }
   0x9   : > { %s44_s18 = ssub.s32 %s438_s14, %s485_s16  ;;  %p54_p0 = scmp.ne.s32.totalorder %s434_s13, %s430_s12 }
   0xa   : > { %p45_p1 = scmp.eq.s32.totalorder %s44_s18, 0  ;;  %p55_p2 = scmp.eq.s32.totalorder %s438_s14, 0 }
   0xb   : > { %p60_p3 = scmp.ne.s32.totalorder %s430_s12, %s426_s11  ;;  %p61_p4 = scmp.eq.s32.totalorder %s481_s0, 0 }
   0xc   : > { %s497_s19 = scalar_select %p45_p1, %s434_s13, %s47_s17  }
   0xd   : > { %p499_p5 = por %p55_p2, %p54_p0  ;;  %p503_p6 = por %p61_p4, %p60_p3 }
   0xe   : > { %p84_p7 = scmp.eq.s32.totalorder %s481_s0, 1  ;;  %p90_p8 = scmp.eq.s32.totalorder %s280_s15, 1 }
   0xf   : > { %p308_p10 = scmp.lt.s32.totalorder %s438_s14, 2  ;;  %s113_s24 = sand.u32 1, %s434_s13  }
  0x10   : > { %p510_p11 = por %p84_p7, %p54_p0  ;;  %p514_p12 = por %p90_p8, %p60_p3 }
  0x11   : > { %s294_s25 = sshll.u32 %s438_s14, 10  ;;  %s283_s26 = sshll.u32 %s113_s24, 6 }
  0x12   : > { %s627_s22 = scalar_select %p510_p11, 1, 0 }
  0x13   : > { %s628_s23 = scalar_select %p514_p12, 1, 0 }
  0x14   : > { %s523_s29 = scalar_lea.hbm %s622_s1, %s294_s25  ;;  %s117_s30 = scalar_lea.vmem [#allocation3], %s283_s26 }
  0x15   : > { %s125_s3 = sshll.u32 %s117_s30, 4  ;;  %p527_p13 = pnand %p308_p10, %p499_p5  ;;  %s531_s3 = int_to_ptr.vmem [resolvable:$true] %s125_s3 }
  0x16   : > { %s114_s5 = scalar_lea.sflag [#allocation4], %s113_s24  ;;  %s342_s6 = scalar_lea.hbm %s523_s29, 1024 }
  0x17   : > { %p343_p2 = scmp.ne.s32.totalorder %s523_s29, %s342_s6  ;;  %p344_p3 = pneg %p527_p13 }
  0x18   : > { %s347_s9 = scalar_lea.hbm %s622_s1, 2048  ;;  %p348_p5 = scmp.lt.u32.totalorder %s523_s29, %s622_s1 }
  0x19   : > { %p345_p4 = pnand %p344_p3, %p343_p2  ;;  %p349_p8 = scmp.lt.u32.totalorder %s347_s9, %s342_s6 }
  0x1a   : > { %p351_p9 = scmp.lt.u32.totalorder %s342_s6, %s523_s29 }
  0x1b   : > { %p346_p7 = pneg %p345_p4  ;;  %p350_p10 = por %p349_p8, %p348_p5 }
  0x1d   : > { %p352_p0 = por %p351_p9, %p350_p10 }
  0x1f   : > { %p353_p1 = pnand %p352_p0, %p346_p7 }
  0x21   : > { %356 = shalt.err (!%p353_p1)
}
  0x22   : > { %s357_s17 = scalar_lea.vmem %s531_s3, 1024  ;;  %s440_s18 = smov [#allocation3]  }
  0x23   : > { %p358_p2 = scmp.ne.s32.totalorder %s531_s3, %s357_s17  ;;  %s362_s20 = sshll.u32 %s440_s18, 4  ;;  %s363_s20 = int_to_ptr.vmem [resolvable:$false] %s362_s20 }
  0x24   : > { %s364_s24 = scalar_lea.vmem %s363_s20, 2048  ;;  %p365_p11 = scmp.lt.s32.totalorder %s531_s3, %s363_s20 }
  0x25   : > { %p360_p4 = pnand %p358_p2, %p344_p3  ;;  %p366_p5 = scmp.lt.s32.totalorder %s364_s24, %s357_s17 }
  0x27   : > { %p361_p12 = pneg %p360_p4  ;;  %p367_p8 = por %p366_p5, %p365_p11 }
  0x29   : > { %p368_p9 = pnand %p367_p8, %p361_p12 }
  0x2b   : > { %371 = shalt.err (!%p368_p9)
}
  0x2c   : > { %303 = dma.hbm_to_vmem [thread:$0]  (!%p527_p13), %s523_s29, 1024, %s531_s3, %s114_s5  }
  0x2d   : > { %p630_p0 = scmp.lt.s32.totalorder %s438_s14, 3  ;;  %p631_p1 = scmp.ge.s32.totalorder %s438_s14, 1 }
  0x2f   : > { %p131_p3 = pnand %p631_p1, %p630_p0 }
  0x30   : > { %s565_s25 = sand.u32 (!%p131_p3), 1, %s430_s12  }
  0x31   : > { %134 = sbr.rel (%p131_p3) target bundleno = 83 (0x53), region = 28  ;;  %s287_s26 = sshll.u32 (!%p131_p3), %s565_s25, 6 }
  0x32   : > { %s137_s27 = scalar_lea.sflag (!%p131_p3), [#allocation4], %s565_s25  ;;  %s140_s28 = scalar_lea.vmem (!%p131_p3), [#allocation3], %s287_s26 }
  0x38   : > { %417 = dma.done.wait (%p503_p6), %s137_s27, 1024  }
  0x39   : > { %419 = vsyncadd (%p503_p6), %s137_s27, 4294966272  ;;  %s169_s29 = sld [smem:[#allocation2]]  ;;  %v161_v0 = vld [vmem:[%s140_s28] sm:$0xff]  ;;  %v162_v2 = vld [vmem:[%s140_s28 + $0x8] sm:$0xff]  ;;  %s295_s30 = sshll.u32 %s481_s0, 10 }
  0x3a   : > { %v163_v3 = vld [vmem:[%s140_s28 + $0x10] sm:$0xff]  ;;  %v164_v4 = vld [vmem:[%s140_s28 + $0x18] sm:$0xff]  ;;  %v165_v5 = vld [vmem:[%s140_s28 + $0x20] sm:$0xff]  ;;  %s160_s3 = scalar_lea.vmem [#allocation6], %s287_s26  ;;  %s577_s5 = scalar_lea.hbm %s623_s2, %s295_s30 }
  0x3b   : > { %v166_v6 = vld [vmem:[%s140_s28 + $0x28] sm:$0xff]  ;;  %s210_s4 = sshll.u32 %s160_s3, 4  ;;  %v167_v10 = vld [vmem:[%s140_s28 + $0x30] sm:$0xff]  ;;  %v168_v11 = vld [vmem:[%s140_s28 + $0x38] sm:$0xff]  ;;  %s196_s6 = scalar_lea.sflag [#allocation5], %s565_s25  ;;  %s579_s4 = int_to_ptr.vmem [resolvable:$true] %s210_s4 }
  0x3c   : > { %s372_s7 = scalar_lea.vmem %s579_s4, 1024  ;;  %p632_p11 = scmp.ne.s32.totalorder %s627_s22, 0 }
  0x3d   : > { %p373_p6 = scmp.ne.s32.totalorder %s579_s4, %s372_s7  ;;  %s441_s8 = smov [#allocation6]  }
  0x3e   : > { %s376_s9 = sshll.u32 %s441_s8, 4  ;;  %s377_s9 = int_to_ptr.vmem [resolvable:$false] %s376_s9 }
  0x3f   : > { %v170_v1 = vstv %s169_s29  ;;  %p374_p12 = pnand %p373_p6, %p632_p11  ;;  %s378_s10 = scalar_lea.vmem %s377_s9, 2048 }
  0x40   : > { %vm171_vm0 = vcmp.ge.f32.partialorder %v161_v0, %v170_v1  ;;  %vm172_vm1 = vcmp.ge.f32.partialorder %v162_v2, %v170_v1  ;;  %vm173_vm2 = vcmp.ge.f32.partialorder %v163_v3, %v170_v1  ;;  %vm174_vm3 = vcmp.ge.f32.partialorder %v164_v4, %v170_v1  ;;  %p379_p7 = scmp.lt.s32.totalorder %s579_s4, %s377_s9  ;;  %p380_p10 = scmp.lt.s32.totalorder %s378_s10, %s372_s7 }
  0x41   : > { %v179_v7 = vsel %vm171_vm0, %v170_v1, 0.0  ;;  %v180_v8 = vsel %vm172_vm1, %v170_v1, 0.0  ;;  %v181_v9 = vsel %vm173_vm2, %v170_v1, 0.0  ;;  %v182_v12 = vsel %vm174_vm3, %v170_v1, 0.0  ;;  %p375_p13 = pneg %p374_p12 }
  0x42   : > { %187 = vst [vmem:[%s160_s3] sm:$0xff] %v179_v7  ;;  %188 = vst [vmem:[%s160_s3 + $0x8] sm:$0xff] %v180_v8  ;;  %vm175_vm4 = vcmp.ge.f32.partialorder %v165_v5, %v170_v1  ;;  %vm176_vm5 = vcmp.ge.f32.partialorder %v166_v6, %v170_v1  ;;  %vm177_vm6 = vcmp.ge.f32.partialorder %v167_v10, %v170_v1  ;;  %p381_p2 = por %p380_p10, %p379_p7 }
  0x43   : > { %189 = vst [vmem:[%s160_s3 + $0x10] sm:$0xff] %v181_v9  ;;  %190 = vst [vmem:[%s160_s3 + $0x18] sm:$0xff] %v182_v12  ;;  %v183_v13 = vsel %vm175_vm4, %v170_v1, 0.0  ;;  %v184_v14 = vsel %vm176_vm5, %v170_v1, 0.0  ;;  %v185_v15 = vsel %vm177_vm6, %v170_v1, 0.0  ;;  %vm178_vm7 = vcmp.ge.f32.partialorder %v168_v11, %v170_v1 }
  0x44   : > { %191 = vst [vmem:[%s160_s3 + $0x20] sm:$0xff] %v183_v13  ;;  %192 = vst [vmem:[%s160_s3 + $0x28] sm:$0xff] %v184_v14  ;;  %v186_v16 = vsel %vm178_vm7, %v170_v1, 0.0  ;;  %p382_p4 = pnand %p381_p2, %p375_p13 }
  0x45   : > { %193 = vst [vmem:[%s160_s3 + $0x30] sm:$0xff] %v185_v15  ;;  %194 = vst [vmem:[%s160_s3 + $0x38] sm:$0xff] %v186_v16 }
  0x46   : > { %385 = shalt.err (!%p382_p4)
}
  0x47   : > { %s386_s15 = scalar_lea.hbm %s577_s5, 1024  ;;  %s390_s20 = scalar_lea.hbm %s623_s2, 2048 }
  0x48   : > { %p387_p5 = scmp.ne.s32.totalorder %s577_s5, %s386_s15  ;;  %p391_p0 = scmp.lt.u32.totalorder %s577_s5, %s623_s2 }
  0x49   : > { %p392_p1 = scmp.lt.u32.totalorder %s390_s20, %s386_s15  ;;  %p394_p6 = scmp.lt.u32.totalorder %s386_s15, %s577_s5 }
  0x4a   : > { %p388_p8 = pnand %p387_p5, %p632_p11 }
  0x4b   : > { %p393_p3 = por %p392_p1, %p391_p0 }
  0x4c   : > { %p389_p9 = pneg %p388_p8 }
  0x4d   : > { %p395_p12 = por %p394_p6, %p393_p3 }
  0x4f   : > { %p396_p13 = pnand %p395_p12, %p389_p9 }
  0x51   : > { %399 = shalt.err (!%p396_p13)
}
  0x52   : > { %298 = dma.vmem_to_hbm [thread:$0]  (%p632_p11), %s579_s4, 1024, %s577_s5, %s196_s6  }
  0x53 PF: > { %s222_s26 = sand.u32 1, %s426_s11   ;;  %p633_p7 = scmp.ne.s32.totalorder %s628_s23, 0 }
  0x54   : > { %p634_p10 = scmp.ge.s32.totalorder %s438_s14, 2  ;;  %s223_s27 = scalar_lea.sflag [#allocation5], %s222_s26 }
  0x56   : > { %p305_p2 = pnand %p634_p10, %p633_p7 }
  0x58   : > { %421 = dma.done.wait (!%p305_p2), %s223_s27, 1024  }
  0x59   : > { %423 = vsyncadd (!%p305_p2), %s223_s27, 4294966272  ;;  %p16_p4 = scmp.ge.s32.totalorder %s485_s16, 4   ;;  %s635_s11 = smov %s430_s12 }
  0x5a   : > { %s636_s12 = smov %s434_s13  ;;  %s637_s13 = smov %s497_s19 }
  0x5b   : > { %s638_s14 = smov %s485_s16  ;;  %18 = sbr.rel (!%p16_p4) target bundleno = 7 (0x7), region = 73 }
  0x62   :  { %228 = vsyncpa [#allocation4], 1 }
  0x63   :  { %230 = vsyncpa [#allocation4 + $0x1], 1 }
  0x64   :  { %231 = vsyncpa [#allocation5], 1 }
  0x65   :  { %233 = vsyncpa [#allocation5 + $0x1], 1 }

</bundles_post_ra>
